<compile_context>
chip_gen: v7x
topology: tpu7x:2x2x1
jax: 0.10.0
libtpu: 0.0.40
codegen_flags: <defaults>
</compile_context>

<pallas_src>
import jax
import jax.numpy as jnp
from jax import lax
from jax.experimental import pallas as pl
from jax.experimental.pallas import tpu as pltpu

# --- small, self-consistent hyperparameters (module uses m=100, n=3, h=20) ---
V = 32           # vocab size
m = 16           # embedding dim
n = 3            # n-gram size
c = (n - 1) * m  # 32, concatenated context features
h = 32           # hidden dim
B = 16           # batch size

LANE = 128
VP = ((V + LANE - 1) // LANE) * LANE   # 128: lane-dense logits / W columns
HP = ((h + LANE - 1) // LANE) * LANE   # 128: lane-dense hidden / H columns
SUB = 16                               # batch padding (full packed bf16 vregs)


def nnlm_kernel(idx_ref, cblk_ref, wh_ref, u_ref, b_ref, d_ref, out_ref):
    """out = b + x@W + tanh(d + x@H)@U, with the embedding gather in-kernel.

    idx_ref : (Bp, n-1)      int32  token indices
    cblk_ref: ((n-1)*V, c)   bf16   block-diagonal embedding table
    wh_ref  : (c, VP+HP)     bf16   fused [W | H], zero-padded to 128 lanes
    u_ref   : (HP, VP)       bf16   U, zero-padded
    b_ref   : (1, VP)        f32    b, zero-padded
    d_ref   : (1, HP)        f32    d, zero-padded
    out_ref : (Bp, VP)       f32    padded logits (lane-dense)
    """
    bp = idx_ref.shape[0]
    n_ctx = idx_ref.shape[1]
    vocab = cblk_ref.shape[0] // n_ctx
    vp = b_ref.shape[1]

    # --- embedding lookup + flatten as a single one-hot MXU matmul ----------
    # one_hot(idx_j + j*V) @ C_blk reproduces C(x).view(-1, c) exactly
    # (position j lands in columns j*m:(j+1)*m of x).
    idx = idx_ref[...]                                              # (Bp, n-1)
    cols = lax.broadcasted_iota(jnp.int32, (bp, n_ctx * vocab), 1)  # (Bp, (n-1)*V)
    hit = cols == idx[:, 0:1]
    for j in range(1, n_ctx):
        hit = jnp.logical_or(hit, cols == idx[:, j:j + 1] + j * vocab)
    onehot = jnp.where(hit, 1.0, 0.0).astype(jnp.bfloat16)
    x = jnp.dot(onehot, cblk_ref[...],
                preferred_element_type=jnp.float32)                 # (Bp, c) f32
    x = x.astype(jnp.bfloat16)        # lossless: rows of the bf16 table

    # --- fused x @ [W | H] in one MXU pass ----------------------------------
    xw = jnp.dot(x, wh_ref[...], preferred_element_type=jnp.float32)  # (Bp, VP+HP)
    logits_w = xw[:, :vp]                                           # (Bp, VP)
    hidden = jnp.tanh(d_ref[...] + xw[:, vp:])                      # (Bp, HP) f32
    out_ref[...] = (
        b_ref[...]
        + logits_w
        + jnp.dot(hidden.astype(jnp.bfloat16), u_ref[...],
                  preferred_element_type=jnp.float32)
    )


def nnlm_forward(x_idx, C_emb, W, H, U, b, d):
    Bsz, n_ctx = x_idx.shape

    # Pad the batch to a multiple of 16 (full sublanes, no host-side assert).
    Bp = max(((Bsz + SUB - 1) // SUB) * SUB, SUB)
    idx_p = jnp.zeros((Bp, n_ctx), jnp.int32).at[:Bsz].set(x_idx.astype(jnp.int32))

    # Block-diagonal embedding table for the in-kernel one-hot gather.
    C_blk = jnp.zeros((n_ctx * V, c), jnp.float32)
    for j in range(n_ctx):
        C_blk = C_blk.at[j * V:(j + 1) * V, j * m:(j + 1) * m].set(C_emb)
    C_blk = C_blk.astype(jnp.bfloat16)

    # Fused + 128-lane-padded weights; bf16 MXU inputs, f32 accumulation.
    W_p = jnp.zeros((c, VP), jnp.float32).at[:, :V].set(W)
    H_p = jnp.zeros((c, HP), jnp.float32).at[:, :h].set(H)
    WH = jnp.concatenate([W_p, H_p], axis=1).astype(jnp.bfloat16)   # (c, VP+HP)
    U_p = jnp.zeros((HP, VP), jnp.float32).at[:h, :V].set(U).astype(jnp.bfloat16)
    b_p = jnp.zeros((1, VP), jnp.float32).at[0, :V].set(b)
    d_p = jnp.zeros((1, HP), jnp.float32).at[0, :h].set(d)

    out_p = pl.pallas_call(
        nnlm_kernel,
        out_shape=jax.ShapeDtypeStruct((Bp, VP), jnp.float32),
        # Whole problem in one grid step: everything fits easily in VMEM on
        # every TPU generation, and a multi-step grid only added per-step
        # pipeline overhead at these sizes.
        grid=(1,),
        in_specs=[
            pl.BlockSpec((Bp, n_ctx), lambda i: (0, 0)),       # token ids
            pl.BlockSpec((n_ctx * V, c), lambda i: (0, 0)),    # block-diag C
            pl.BlockSpec((c, VP + HP), lambda i: (0, 0)),      # fused [W | H]
            pl.BlockSpec((HP, VP), lambda i: (0, 0)),          # U
            pl.BlockSpec((1, VP), lambda i: (0, 0)),           # b
            pl.BlockSpec((1, HP), lambda i: (0, 0)),           # d
        ],
        out_specs=pl.BlockSpec((Bp, VP), lambda i: (0, 0)),
        compiler_params=pltpu.CompilerParams(
            # Single step: no benefit from megacore splitting this tiny kernel.
            dimension_semantics=("arbitrary",)),
    )(idx_p, C_blk, WH, U_p, b_p, d_p)

    return out_p[:Bsz, :V]


if __name__ == "__main__":
    key = jax.random.PRNGKey(0)
    k_idx, k_C, k_b, k_W, k_U, k_d, k_H = jax.random.split(key, 7)

    # Deterministic synthetic parameters (shapes from NNLM.__init__).
    x_idx = jax.random.randint(k_idx, (B, n - 1), 0, V, dtype=jnp.int32)
    C_emb = jax.random.normal(k_C, (V, m), dtype=jnp.float32)
    b = jax.random.normal(k_b, (V,), dtype=jnp.float32)
    W = jax.random.normal(k_W, (c, V), dtype=jnp.float32)
    U = jax.random.normal(k_U, (h, V), dtype=jnp.float32)
    d = jax.random.normal(k_d, (h,), dtype=jnp.float32)
    H = jax.random.normal(k_H, (c, h), dtype=jnp.float32)

    out = jax.jit(nnlm_forward)(x_idx, C_emb, W, H, U, b, d)
    out = jax.block_until_ready(out)
    assert out.shape == (B, V)

    # Precision-matched reference: same bf16 MXU inputs / f32 accumulation as
    # the kernel (bf16 inputs mean the old 1e-4 f32 tolerance no longer applies).
    f32 = jnp.float32
    xb = jnp.take(C_emb, x_idx, axis=0).reshape(-1, c).astype(jnp.bfloat16).astype(f32)
    Wb = W.astype(jnp.bfloat16).astype(f32)
    Hb = H.astype(jnp.bfloat16).astype(f32)
    Ub = U.astype(jnp.bfloat16).astype(f32)
    hid = jnp.tanh(d + xb @ Hb).astype(jnp.bfloat16).astype(f32)
    ref = b + xb @ Wb + hid @ Ub
    assert jnp.allclose(out, ref, atol=2e-2, rtol=2e-2), \
        float(jnp.max(jnp.abs(out - ref)))

    print("KERNEL_OK")
</pallas_src>

<mosaic_0001>
module attributes {stable_mosaic.version = 11 : i64} {
  func.func @nnlm_kernel(%arg0: i32, %arg1: memref<16x2xi32, #tpu.memory_space<vmem>>, %arg2: memref<64x32xbf16, #tpu.memory_space<vmem>>, %arg3: memref<32x256xbf16, #tpu.memory_space<vmem>>, %arg4: memref<128x128xbf16, #tpu.memory_space<vmem>>, %arg5: memref<1x128xf32, #tpu.memory_space<vmem>>, %arg6: memref<1x128xf32, #tpu.memory_space<vmem>>, %arg7: memref<16x128xf32, #tpu.memory_space<vmem>>) attributes {dimension_semantics = [#tpu.dimension_semantics<arbitrary>], iteration_bounds = array<i64: 1>, scalar_prefetch = 0 : i64, scratch_operands = 0 : i64, tpu.core_type = #tpu.core_type<tc>, window_params = [{pipeline_mode = #tpu.pipeline_mode<synchronous>, transform_indices = @transform_0, window_bounds = array<i64: 16, 2>}, {pipeline_mode = #tpu.pipeline_mode<synchronous>, transform_indices = @transform_1, window_bounds = array<i64: 64, 32>}, {pipeline_mode = #tpu.pipeline_mode<synchronous>, transform_indices = @transform_2, window_bounds = array<i64: 32, 256>}, {pipeline_mode = #tpu.pipeline_mode<synchronous>, transform_indices = @transform_3, window_bounds = array<i64: 128, 128>}, {pipeline_mode = #tpu.pipeline_mode<synchronous>, transform_indices = @transform_4, window_bounds = array<i64: 1, 128>}, {pipeline_mode = #tpu.pipeline_mode<synchronous>, transform_indices = @transform_5, window_bounds = array<i64: 1, 128>}, {pipeline_mode = #tpu.pipeline_mode<synchronous>, transform_indices = @transform_6, window_bounds = array<i64: 16, 128>}]} {
    %c0 = arith.constant 0 : index
    %c0_0 = arith.constant 0 : index
    %0 = vector.load %arg1[%c0, %c0_0] : memref<16x2xi32, #tpu.memory_space<vmem>>, vector<16x2xi32>
    %1 = tpu.iota {dimensions = array<i32: 1>} : vector<16x64xi32>
    %2 = vector.extract_strided_slice %0 {offsets = [0, 0], sizes = [16, 1], strides = [1, 1]} : vector<16x2xi32> to vector<16x1xi32>
    %3 = vector.broadcast %2 : vector<16x1xi32> to vector<16x64xi32>
    %4 = arith.cmpi eq, %1, %3 : vector<16x64xi32>
    %5 = vector.extract_strided_slice %0 {offsets = [0, 1], sizes = [16, 1], strides = [1, 1]} : vector<16x2xi32> to vector<16x1xi32>
    %c32_i32 = arith.constant 32 : i32
    %6 = vector.broadcast %c32_i32 : i32 to vector<16x1xi32>
    %7 = arith.addi %5, %6 : vector<16x1xi32>
    %8 = vector.broadcast %7 : vector<16x1xi32> to vector<16x64xi32>
    %9 = arith.cmpi eq, %1, %8 : vector<16x64xi32>
    %10 = arith.ori %4, %9 : vector<16x64xi1>
    %cst = arith.constant 1.000000e+00 : f32
    %cst_1 = arith.constant 0.000000e+00 : f32
    %11 = vector.broadcast %cst : f32 to vector<16x64xf32>
    %12 = vector.broadcast %cst_1 : f32 to vector<16x64xf32>
    %13 = arith.select %10, %11, %12 : vector<16x64xi1>, vector<16x64xf32>
    %14 = arith.truncf %13 : vector<16x64xf32> to vector<16x64xbf16>
    %c0_2 = arith.constant 0 : index
    %c0_3 = arith.constant 0 : index
    %15 = vector.load %arg2[%c0_2, %c0_3] : memref<64x32xbf16, #tpu.memory_space<vmem>>, vector<64x32xbf16>
    %cst_4 = arith.constant dense<0.000000e+00> : vector<16x32xf32>
    %16 = tpu.matmul %14, %15, %cst_4 {dimension_numbers = #tpu.dot_dimension_numbers<[1], [0], [0], [1], [0, 0, 1, 1], [], []>} : vector<16x64xbf16>, vector<64x32xbf16>, vector<16x32xf32> -> vector<16x32xf32>
    %17 = arith.truncf %16 : vector<16x32xf32> to vector<16x32xbf16>
    %c0_5 = arith.constant 0 : index
    %c0_6 = arith.constant 0 : index
    %18 = vector.load %arg3[%c0_5, %c0_6] : memref<32x256xbf16, #tpu.memory_space<vmem>>, vector<32x256xbf16>
    %cst_7 = arith.constant dense<0.000000e+00> : vector<16x256xf32>
    %19 = tpu.matmul %17, %18, %cst_7 {dimension_numbers = #tpu.dot_dimension_numbers<[1], [0], [0], [1], [0, 0, 1, 1], [], []>} : vector<16x32xbf16>, vector<32x256xbf16>, vector<16x256xf32> -> vector<16x256xf32>
    %20 = vector.extract_strided_slice %19 {offsets = [0, 0], sizes = [16, 128], strides = [1, 1]} : vector<16x256xf32> to vector<16x128xf32>
    %c0_8 = arith.constant 0 : index
    %c0_9 = arith.constant 0 : index
    %21 = vector.load %arg6[%c0_8, %c0_9] : memref<1x128xf32, #tpu.memory_space<vmem>>, vector<1x128xf32>
    %22 = vector.extract_strided_slice %19 {offsets = [0, 128], sizes = [16, 128], strides = [1, 1]} : vector<16x256xf32> to vector<16x128xf32>
    %23 = vector.broadcast %21 : vector<1x128xf32> to vector<16x128xf32>
    %24 = arith.addf %23, %22 : vector<16x128xf32>
    %25 = math.tanh %24 : vector<16x128xf32>
    %c0_10 = arith.constant 0 : index
    %c0_11 = arith.constant 0 : index
    %26 = vector.load %arg5[%c0_10, %c0_11] : memref<1x128xf32, #tpu.memory_space<vmem>>, vector<1x128xf32>
    %27 = vector.broadcast %26 : vector<1x128xf32> to vector<16x128xf32>
    %28 = arith.addf %27, %20 : vector<16x128xf32>
    %29 = arith.truncf %25 : vector<16x128xf32> to vector<16x128xbf16>
    %c0_12 = arith.constant 0 : index
    %c0_13 = arith.constant 0 : index
    %30 = vector.load %arg4[%c0_12, %c0_13] : memref<128x128xbf16, #tpu.memory_space<vmem>>, vector<128x128xbf16>
    %cst_14 = arith.constant dense<0.000000e+00> : vector<16x128xf32>
    %31 = tpu.matmul %29, %30, %cst_14 {dimension_numbers = #tpu.dot_dimension_numbers<[1], [0], [0], [1], [0, 0, 1, 1], [], []>} : vector<16x128xbf16>, vector<128x128xbf16>, vector<16x128xf32> -> vector<16x128xf32>
    %32 = arith.addf %28, %31 : vector<16x128xf32>
    %c0_15 = arith.constant 0 : index
    %c0_16 = arith.constant 0 : index
    %33 = vector.load %arg7[%c0_15, %c0_16] : memref<16x128xf32, #tpu.memory_space<vmem>>, vector<16x128xf32>
    tpu.vector_store %arg7[%c0_15, %c0_16], %32 {strides = array<i32>} : memref<16x128xf32, #tpu.memory_space<vmem>>, vector<16x128xf32>,
    return
  }
  func.func @transform_0(%arg0: i32) -> (i32, i32) {
    %c0_i32 = arith.constant 0 : i32
    %c0_i32_0 = arith.constant 0 : i32
    %c0_i32_1 = arith.constant 0 : i32
    return %c0_i32, %c0_i32_0 : i32, i32
  }
  func.func @transform_1(%arg0: i32) -> (i32, i32) {
    %c0_i32 = arith.constant 0 : i32
    %c0_i32_0 = arith.constant 0 : i32
    %c0_i32_1 = arith.constant 0 : i32
    return %c0_i32, %c0_i32_0 : i32, i32
  }
  func.func @transform_2(%arg0: i32) -> (i32, i32) {
    %c0_i32 = arith.constant 0 : i32
    %c0_i32_0 = arith.constant 0 : i32
    %c0_i32_1 = arith.constant 0 : i32
    return %c0_i32, %c0_i32_0 : i32, i32
  }
  func.func @transform_3(%arg0: i32) -> (i32, i32) {
    %c0_i32 = arith.constant 0 : i32
    %c0_i32_0 = arith.constant 0 : i32
    %c0_i32_1 = arith.constant 0 : i32
    return %c0_i32, %c0_i32_0 : i32, i32
  }
  func.func @transform_4(%arg0: i32) -> (i32, i32) {
    %c0_i32 = arith.constant 0 : i32
    %c0_i32_0 = arith.constant 0 : i32
    %c0_i32_1 = arith.constant 0 : i32
    return %c0_i32, %c0_i32_0 : i32, i32
  }
  func.func @transform_5(%arg0: i32) -> (i32, i32) {
    %c0_i32 = arith.constant 0 : i32
    %c0_i32_0 = arith.constant 0 : i32
    %c0_i32_1 = arith.constant 0 : i32
    return %c0_i32, %c0_i32_0 : i32, i32
  }
  func.func @transform_6(%arg0: i32) -> (i32, i32) {
    %c0_i32 = arith.constant 0 : i32
    %c0_i32_0 = arith.constant 0 : i32
    %c0_i32_1 = arith.constant 0 : i32
    return %c0_i32, %c0_i32_0 : i32, i32
  }
}

</mosaic_0001>

<bundles_post_ra>
// kernel: nnlm_forward.1
= control target key start
LH: loop header
LB: loop body
LE: loop exit
PB: predicated region body
PF: predicated region fallthrough
CT: control target
= control target key end

     0   :  { %v469_v3 = vmov 0   ;;  %v470_v4 = vmov 1   ;;  %v471_v6 = vmov 0.0   ;;  %vm472_vm0 = vmmov 0   ;;  %s599_s0 = inlined_call_operand.vmem [shape: s32[16,2], index: 0, kind: input, shape index: {}]   ;;  %s600_s1 = inlined_call_operand.vmem [shape: bf16[64,32], index: 1, kind: input, shape index: {}]   ;;  %s601_s2 = inlined_call_operand.vmem [shape: bf16[32,256], index: 2, kind: input, shape index: {}]   ;;  %s602_s3 = inlined_call_operand.vmem [shape: bf16[128,128], index: 3, kind: input, shape index: {}]   ;;  %s603_s4 = inlined_call_operand.vmem [shape: f32[1,128], index: 4, kind: input, shape index: {}]   ;;  %s604_s5 = inlined_call_operand.vmem [shape: f32[1,128], index: 5, kind: input, shape index: {}]   ;;  %s605_s6 = inlined_call_operand.hbm [shape: f32[16,128], index: 6, kind: output, shape index: {}]  }
   0x1   :  { %v25_v0 = vld [vmem:[%s599_s0] sm:$0xff]  ;;  %v26_v1 = vld [vmem:[%s599_s0 + $0x8] sm:$0xff]  ;;  %420 = vset.pattern.permute.xlu0 %v469_v3  ;;  %421 = vset.pattern.permute.xlu1 %v470_v4  ;;  %v425_v9 = vld [vmem:[%s600_s1 + $0x10] sm:$0xff]  }
   0x2   :  { %v423_v2 = vld [vmem:[%s600_s1] sm:$0xff]   ;;  %v37_v5 = vadd.s32 32, %v25_v0  ;;  %30 = vperm.xlu0 %420, %v25_v0   ;;  %381 = vmatprep.subr.bf16.mxu0 %v471_v6  ;;  %v38_v7 = vadd.s32 32, %v26_v1  ;;  %v424_v8 = vld [vmem:[%s600_s1 + $0x8] sm:$0xff]   ;;  %v426_v10 = vld [vmem:[%s600_s1 + $0x18] sm:$0xff]  }
   0x3   :  { %382 = vmatpush3.bf16.msra.mxu0 %v423_v2  ;;  %393 = vmatprep.subr.bf16.mxu1 %v471_v6  ;;  %v429_v11 = vld [vmem:[%s601_s2 + $0x4] ss:$8 sps:$4 sm:$0xff]  }
   0x4   :  { %40 = vperm.xlu1 %421, %v37_v5   ;;  %383 = vmatprep.subr.bf16.mxu0 %v471_v6 }
   0x5   :  { %389 = vmatprep.mubr.msk.bf16.mxu0 %vm472_vm0, %v471_v6  ;;  %409 = vmatprep.mubr.msk.bf16.mxu1 %vm472_vm0, %v471_v6 }
   0x6   :  { %33 = vperm.xlu0 %420, %v26_v1  }
   0x7   :  { %384 = vmatpush3.bf16.msra.mxu0 %v424_v8 }
   0x8   :  { %43 = vperm.xlu1 %421, %v38_v7   ;;  %385 = vmatprep.subr.bf16.mxu0 %v471_v6 }
   0xa   :  { %422 = vset.pattern.permute.xlu0 %v470_v4 }
   0xb   :  { %386 = vmatpush3.bf16.msra.mxu0 %v425_v9 }
   0xc   :  { %387 = vmatprep.subr.bf16.mxu0 %v471_v6 }
   0xd   :  { %11 = vsyncpa [#allocation3], 0  ;;  %v27_v12 = vlaneseq  ;;  %vm84_vm7 = vcmask 523264   ;;  %v427_v20 = vld [vmem:[%s601_s2] ss:$8 sps:$4 sm:$0xff]   ;;  %v435_v26 = vld [vmem:[%s602_s3 + $0x10] sm:$0xff]  }
   0xe   :  { %v432_v22 = vld [vmem:[%s601_s2 + $0x14] ss:$8 sps:$4 sm:$0xff]   ;;  %v430_v23 = vld [vmem:[%s601_s2 + $0x10] ss:$8 sps:$4 sm:$0xff]   ;;  %v433_v24 = vld [vmem:[%s602_s3] sm:$0xff]   ;;  %vm154_vm8 = vcmask 261120  }
   0xf   :  { %388 = vmatpush3.bf16.msra.mxu0 %v426_v10  ;;  %v28_v13 = vand.u32 127, %v27_v12  ;;  %394 = vmatpush3.bf16.msra.mxu1 %v433_v24  ;;  %v434_v25 = vld [vmem:[%s602_s3 + $0x8] sm:$0xff]   ;;  %v436_v32 = vld [vmem:[%s602_s3 + $0x18] sm:$0xff]   ;;  %v437_v33 = vld [vmem:[%s602_s3 + $0x20] sm:$0xff]   ;;  %s473_s8 = smov [#allocation2]  }
  0x10   :  { %158 = vmatprep.subr.bf16.mxu0 %v429_v11  ;;  %395 = vmatprep.subr.bf16.mxu1 %v471_v6  ;;  %v438_v34 = vld [vmem:[%s602_s3 + $0x28] sm:$0xff]   ;;  %v439_v35 = vld [vmem:[%s602_s3 + $0x30] sm:$0xff]   ;;  %v440_v36 = vld [vmem:[%s602_s3 + $0x38] sm:$0xff]   ;;  %s336_s9 = sshll.u32 %s473_s8, 4  ;;  %s337_s9 = int_to_ptr.vmem [resolvable:$true] %s336_s9 }
  0x11   :  { %v357_v37 = vld [vmem:[%s604_s5] ss:$0 sm:$0xff]  ;;  %s445_s5 = scalar_lea.vmem %s337_s9, 256  ;;  %p450_p1 = scmp.lt.s32.totalorder %s337_s9, %s337_s9 }
  0x12   :  { %v358_v47 = vld [vmem:[%s603_s4] ss:$0 sm:$0xff]  ;;  %p446_p0 = scmp.ne.s32.totalorder %s337_s9, %s445_s5  ;;  %p451_p2 = scmp.lt.s32.totalorder %s445_s5, %s445_s5 }
  0x13   :  { %396 = vmatpush3.bf16.msra.mxu1 %v434_v25 }
  0x14   :  { %397 = vmatprep.subr.bf16.mxu1 %v471_v6  ;;  %p452_p3 = por %p451_p2, %p450_p1 }
  0x16   :  { %p453_p4 = pnand %p452_p3, %p446_p0 }
  0x17   :  { %398 = vmatpush3.bf16.msra.mxu1 %v435_v26 }
  0x18   :  { %399 = vmatprep.subr.bf16.mxu1 %v471_v6 }
  0x1b   :  { %400 = vmatpush3.bf16.msra.mxu1 %v436_v32 }
  0x1c   :  { %401 = vmatprep.subr.bf16.mxu1 %v471_v6 }
  0x1f   :  { %402 = vmatpush3.bf16.msra.mxu1 %v437_v33 }
  0x20   :  { %403 = vmatprep.subr.bf16.mxu1 %v471_v6 }
  0x23   :  { %404 = vmatpush3.bf16.msra.mxu1 %v438_v34 }
  0x24   :  { %405 = vmatprep.subr.bf16.mxu1 %v471_v6 }
  0x27   :  { %406 = vmatpush3.bf16.msra.mxu1 %v439_v35 }
  0x28   :  { %407 = vmatprep.subr.bf16.mxu1 %v471_v6 }
  0x2b   :  { %408 = vmatpush3.bf16.msra.mxu1 %v440_v36 }
  0x81   :  { %v31_v14 = vpop.permute.xlu0 %30 }
  0x82   :  { %vm35_vm1 = vcmp.eq.s32.totalorder %v28_v13, %v31_v14 }
  0x83   :  { %v41_v15 = vpop.permute.xlu1 %40 }
  0x84   :  { %vm45_vm2 = vcmp.eq.s32.totalorder %v28_v13, %v41_v15 }
  0x85   :  { %v34_v16 = vpop.permute.xlu0 %33  ;;  %vm47_vm3 = vmor %vm35_vm1, %vm45_vm2 }
  0x86   :  { %vm36_vm4 = vcmp.eq.s32.totalorder %v28_v13, %v34_v16  ;;  %v49_v18 = vsel %vm47_vm3, 1.0, %v471_v6 }
  0x87   :  { %v44_v17 = vpop.permute.xlu1 %43 }
  0x88   :  { %vm46_vm5 = vcmp.eq.s32.totalorder %v28_v13, %v44_v17 }
  0x89   :  { %vm48_vm6 = vmor %vm36_vm4, %vm46_vm5 }
  0x8a   :  { %v50_v19 = vsel %vm48_vm6, 1.0, %v471_v6 }
  0x8b   :  { %v51_v21 = vpack.c.bf16 %v50_v19, %v49_v18 }
  0x8d   :  { %390 = vmatmul.mubr.msk.bf16.vlgmr.msra.gmra.mrb[0].mxu0 %vm84_vm7, %v51_v21 }
  0x8e   :  { %159 = vmatpush1.bf16.msra.mxu0 %v427_v20  ;;  %190 = vmatprep.mubr.bf16.mxu0 %v469_v3 }
  0x8f   :  { %160 = vmatprep.subr.bf16.mxu0 %v432_v22 }
  0x92   :  { %161 = vmatpush1.bf16.msra.mxu0 %v430_v23 }
 0x160   :  { %v122_v27 = vpop.f32.mrb[0].mxu0 }
 0x161   :  { %v391_v28 = vpop.f32.mrb[1].mxu0 }
 0x162   :  { %v125_v29 = vpop.f32.mrb[2].mxu0 }
 0x163   :  { %v129_v30 = vpack.c.bf16 %v125_v29, %v122_v27  ;;  %v392_v31 = vpop.f32.mrb[3].mxu0 }
 0x165   :  { %356 = vmatmul.mubr.msk.bf16.vlgmr.msra.gmra.mrb[4].mxu0 %vm154_vm8, %v129_v30 }
 0x238   :  { %v192_v38 = vpop.f32.mrb[4].mxu0 }
 0x239   :  { %v194_v39 = vpop.f32.mrb[5].mxu0  ;;  %v219_v48 = vadd.f32 %v358_v47, %v192_v38 }
 0x23a   :  { %v208_v40 = vadd.f32 %v357_v37, %v194_v39  ;;  %v196_v41 = vpop.f32.mrb[6].mxu0 }
 0x23b   :  { %v198_v42 = vpop.f32.mrb[7].mxu0  ;;  %v220_v50 = vadd.f32 %v358_v47, %v196_v41 }
 0x23c   :  { %v209_v43 = vadd.f32 %v357_v37, %v198_v42  ;;  %441 = vtanh.f32 %v208_v40 }
 0x23e   :  { %443 = vtanh.f32 %v209_v43 }
 0x246   :  { %v442_v44 = vpop.eup %441 }
 0x248   :  { %v444_v45 = vpop.eup %443 }
 0x249   :  { %v221_v46 = vpack.c.bf16 %v444_v45, %v442_v44 }
 0x24b   :  { %410 = vmatmul.mubr.bf16.vlgmr.msra.gmra.mrb[0].mxu1 %v221_v46 }
 0x31e   :  { %v320_v49 = vpop.f32.mrb[0].mxu1 }
 0x31f   :  { %v327_v51 = vadd.f32 %v320_v49, %v219_v48  ;;  %v411_v52 = vpop.f32.mrb[1].mxu1 }
 0x320   :  { %v323_v53 = vpop.f32.mrb[2].mxu1 }
 0x321   :  { %329 = vst [vmem:[#allocation2] sm:$0xff] %v327_v51  ;;  %v328_v54 = vadd.f32 %v323_v53, %v220_v50  ;;  %v412_v55 = vpop.f32.mrb[3].mxu1 }
 0x323   :  { %330 = vst [vmem:[#allocation2 + $0x8] sm:$0xff] %v328_v54 }
 0x324   :  { %456 = shalt.err (!%p453_p4)
}
 0x325   :  { %s457_s10 = scalar_lea.hbm %s605_s6, 256 }
 0x326   :  { %p458_p5 = scmp.ne.s32.totalorder %s605_s6, %s457_s10  ;;  %p461_p6 = scmp.lt.u32.totalorder %s457_s10, %s605_s6 }
 0x328   :  { %p463_p7 = pnand %p461_p6, %p458_p5 }
 0x32a   :  { %466 = shalt.err (!%p463_p7)
}
 0x32b   :  { %s474_s15 = smov 128   ;;  %s475_s16 = smov 8  }
 0x32c   :  { %342 = dma.vmem_to_hbm [thread:$0]  %s337_s9, 256, %s605_s6, [#allocation3], %s474_s15, %s474_s15, %s475_s16  }
 0x32d   :  { %467 = dma.done.wait [#allocation3], 256  }
 0x32e   :  { %468 = vsyncadd [#allocation3], 4294967040 }
 0x32f   :  { %346 = vsyncpa [#allocation3], 1 }

</bundles_post_ra>
